<compile_context>
chip_gen: v6e
topology: v6e:2x2x1
jax: 0.10.0
libtpu: 0.0.40
codegen_flags: <defaults>
</compile_context>

<pallas_src>
import math
import jax
import jax.numpy as jnp
import numpy as np
from jax.experimental import pallas as pl
from jax.experimental.pallas import tpu as pltpu

# ---- Mamba default hyper-parameters (from the PyTorch module __init__) ----
D_MODEL = 128
D_STATE = 4
D_CONV = 3
EXPAND = 1
D_INNER = EXPAND * D_MODEL
DT_RANK = math.ceil(D_MODEL / 16)      # = 8
RMS_EPS = 1e-5
DT_MIN, DT_MAX, DT_SCALE, DT_INIT_FLOOR = 1e-3, 0.1, 1.0, 1e-4

MAX_L_CHUNK = 512


def _pick_chunk(L):
    """Largest divisor of L that is <= MAX_L_CHUNK and a multiple of 8 (or L itself)."""
    for c in range(min(L, MAX_L_CHUNK), 0, -1):
        if L % c == 0 and (c % 8 == 0 or c == L):
            return c
    return L


def mamba_block_kernel(x_ref, in_w_ref, conv_w_ref, conv_b_ref,
                       xproj_ref, dt_b_ref, a_ref, d_par_ref, out_w_ref,
                       o_ref,
                       h_scr, conv_scr, dab_ref, bx_ref, hs_ref):
    Lc = x_ref.shape[1]
    chunk = pl.program_id(1)

    # ---- reset cross-chunk state at the start of each sequence ----
    @pl.when(chunk == 0)
    def _init():
        h_scr[...] = jnp.zeros_like(h_scr)
        conv_scr[...] = jnp.zeros_like(conv_scr)

    x = x_ref[0]                                           # (Lc, D_MODEL) f32

    # ---- RMSNorm (no learnable scale, matches reference) ----
    xn = x * jax.lax.rsqrt(jnp.mean(x * x, axis=-1, keepdims=True) + RMS_EPS)

    # ---- in_proj (bias=False), bf16 MXU with f32 accumulation ----
    xz = jnp.dot(xn.astype(jnp.bfloat16), in_w_ref[...],
                 preferred_element_type=jnp.float32)       # (Lc, 2*D_INNER)
    xp = xz[:, :D_INNER]
    z = xz[:, D_INNER:]

    # ---- causal depthwise conv1d (+bias, SiLU) with cross-chunk carry ----
    xp_prev = conv_scr[...]                                # (D_CONV-1, D_INNER)
    if Lc >= D_CONV - 1:
        conv_scr[...] = xp[Lc - (D_CONV - 1):, :]          # carry for next chunk
    xp_ext = jnp.concatenate([xp_prev, xp], axis=0)        # (Lc + D_CONV - 1, D_INNER)
    conv_w = conv_w_ref[...]                               # (D_CONV, D_INNER)
    acc = xp_ext[0:Lc, :] * conv_w[0:1, :]
    for k in range(1, D_CONV):
        acc = acc + xp_ext[k:k + Lc, :] * conv_w[k:k + 1, :]
    xc = acc + conv_b_ref[...]
    xc = xc * jax.nn.sigmoid(xc)                           # SiLU

    # ---- fused (x_proj ∘ dt_proj): one matmul -> [delta_pre | B | C] ----
    dbc = jnp.dot(xc.astype(jnp.bfloat16), xproj_ref[...],
                  preferred_element_type=jnp.float32)      # (Lc, D_INNER + 2*S)
    delta_pre = dbc[:, :D_INNER] + dt_b_ref[...]
    Bm = dbc[:, D_INNER:D_INNER + D_STATE]                 # (Lc, S)
    Cm = dbc[:, D_INNER + D_STATE:]                        # (Lc, S)

    # softplus with threshold 20 (matches F.softplus); kept in f32
    delta = jnp.where(delta_pre > 20.0, delta_pre,
                      jnp.log(1.0 + jnp.exp(jnp.minimum(delta_pre, 20.0))))

    # ---- build (Lc, D_STATE*D_INNER) scan slabs (all states in one shot) ----
    dx = delta * xc
    for s in range(D_STATE):
        a_s = a_ref[:, s * D_INNER:(s + 1) * D_INNER]      # (1, D_INNER), A = -exp(A_log)
        dab_ref[:, s * D_INNER:(s + 1) * D_INNER] = jnp.exp(delta * a_s)
        bx_ref[:, s * D_INNER:(s + 1) * D_INNER] = dx * Bm[:, s:s + 1]

    # ---- selective scan: h_t = dA_t * h_{t-1} + bx_t (vectorized over S*D) ----
    def scan_body(t, h):
        h = dab_ref[pl.ds(t, 1), :] * h + bx_ref[pl.ds(t, 1), :]
        hs_ref[pl.ds(t, 1), :] = h
        return h

    h_last = jax.lax.fori_loop(0, Lc, scan_body, h_scr[...])
    h_scr[...] = h_last                                    # carry state to next chunk

    hs = hs_ref[...]                                       # (Lc, S*D_INNER)
    y = d_par_ref[...] * xc
    for s in range(D_STATE):
        y = y + hs[:, s * D_INNER:(s + 1) * D_INNER] * Cm[:, s:s + 1]

    # ---- gate, out_proj (bias=False), residual ----
    out = y * (z * jax.nn.sigmoid(z))
    out = jnp.dot(out.astype(jnp.bfloat16), out_w_ref[...],
                  preferred_element_type=jnp.float32)      # (Lc, D_MODEL)
    o_ref[0] = x + out


def mamba_forward_pallas(x, p, l_chunk=None):
    B, L, Dm = x.shape
    assert Dm == D_MODEL
    if l_chunk is None:
        l_chunk = _pick_chunk(L)
    assert L % l_chunk == 0
    n_chunks = L // l_chunk
    if n_chunks > 1:
        assert l_chunk >= D_CONV - 1, "chunk must cover the conv receptive field carry"

    # ---- host-side weight prep (layout + dt_proj fold + bf16 for MXU) ----
    # W_delta = x_proj_w[:R].T @ dt_proj_w.T  (D_INNER, D_INNER)
    w_delta = p["x_proj_w"][:DT_RANK, :].T @ p["dt_proj_w"].T
    w_b = p["x_proj_w"][DT_RANK:DT_RANK + D_STATE, :].T            # (D_INNER, S)
    w_c = p["x_proj_w"][DT_RANK + D_STATE:, :].T                   # (D_INNER, S)
    xproj_comb = jnp.concatenate([w_delta, w_b, w_c], axis=1).astype(jnp.bfloat16)

    # A laid out flat so column block s matches the scan slab layout
    a_flat = (-jnp.exp(p["A_log"])).T.reshape(1, D_STATE * D_INNER).astype(jnp.float32)

    weights = [
        p["in_proj_w"].T.astype(jnp.bfloat16),     # (D_MODEL, 2*D_INNER)
        p["conv_w"].T.astype(jnp.float32),         # (D_CONV, D_INNER)
        p["conv_b"][None, :].astype(jnp.float32),  # (1, D_INNER)
        xproj_comb,                                # (D_INNER, D_INNER + 2*S) bf16
        p["dt_proj_b"][None, :].astype(jnp.float32),
        a_flat,                                    # (1, S*D_INNER) f32
        p["D"][None, :].astype(jnp.float32),
        p["out_proj_w"].T.astype(jnp.bfloat16),    # (D_INNER, D_MODEL)
    ]

    in_specs = [pl.BlockSpec((1, l_chunk, Dm), lambda b, c: (b, c, 0))]
    for w in weights:
        in_specs.append(pl.BlockSpec(w.shape, lambda b, c: (0, 0)))

    flops = int(
        2 * B * L * (D_MODEL * 2 * D_INNER
                     + D_INNER * (D_INNER + 2 * D_STATE)
                     + D_INNER * D_MODEL)
        + B * L * D_INNER * (12 + 8 * D_STATE))
    transcendentals = int(B * L * D_INNER * (D_STATE + 4))
    bytes_accessed = int(4 * 2 * B * L * D_MODEL
                         + sum(int(np.prod(w.shape)) * w.dtype.itemsize for w in weights))
    cost = pl.CostEstimate(flops=flops, transcendentals=transcendentals,
                           bytes_accessed=bytes_accessed)

    return pl.pallas_call(
        mamba_block_kernel,
        out_shape=jax.ShapeDtypeStruct((B, L, Dm), jnp.float32),
        grid_spec=pltpu.PrefetchScalarGridSpec(
            num_scalar_prefetch=0,
            grid=(B, n_chunks),
            in_specs=in_specs,
            out_specs=pl.BlockSpec((1, l_chunk, Dm), lambda b, c: (b, c, 0)),
            scratch_shapes=[
                pltpu.VMEM((1, D_STATE * D_INNER), jnp.float32),        # h carry
                pltpu.VMEM((D_CONV - 1, D_INNER), jnp.float32),         # conv carry
                pltpu.VMEM((l_chunk, D_STATE * D_INNER), jnp.float32),  # exp(delta*A)
                pltpu.VMEM((l_chunk, D_STATE * D_INNER), jnp.float32),  # delta*B*x
                pltpu.VMEM((l_chunk, D_STATE * D_INNER), jnp.float32),  # hs
            ],
        ),
        compiler_params=pltpu.CompilerParams(
            dimension_semantics=("parallel", "arbitrary"),
            vmem_limit_bytes=48 * 1024 * 1024,
        ),
        cost_estimate=cost,
    )(x, *weights)


def init_params(key):
    ks = jax.random.split(key, 7)

    def uni(k, shape, bound):
        return jax.random.uniform(k, shape, jnp.float32, -bound, bound)

    dt_init_std = DT_RANK ** (-0.5) * DT_SCALE
    dt = jnp.exp(jax.random.uniform(ks[5], (D_INNER,), jnp.float32)
                 * (math.log(DT_MAX) - math.log(DT_MIN)) + math.log(DT_MIN))
    dt = jnp.clip(dt, DT_INIT_FLOOR, None)
    inv_dt = dt + jnp.log(-jnp.expm1(-dt))

    return {
        "in_proj_w": uni(ks[0], (2 * D_INNER, D_MODEL), 1.0 / math.sqrt(D_MODEL)),
        "conv_w":    uni(ks[1], (D_INNER, D_CONV), 1.0 / math.sqrt(D_CONV)),
        "conv_b":    uni(ks[2], (D_INNER,), 1.0 / math.sqrt(D_CONV)),
        "x_proj_w":  uni(ks[3], (DT_RANK + 2 * D_STATE, D_INNER), 1.0 / math.sqrt(D_INNER)),
        "dt_proj_w": uni(ks[4], (D_INNER, DT_RANK), dt_init_std),
        "dt_proj_b": inv_dt,
        "A_log": jnp.log(jnp.tile(jnp.arange(1, D_STATE + 1, dtype=jnp.float32), (D_INNER, 1))),
        "D": jnp.ones((D_INNER,), jnp.float32),
        "out_proj_w": uni(ks[6], (D_MODEL, D_INNER), 1.0 / math.sqrt(D_INNER)),
    }


def mamba_forward_reference(x, p):
    """Pure-JAX f32 reference identical to the PyTorch forward semantics."""
    B, L, Dm = x.shape
    xn = x * jax.lax.rsqrt(jnp.mean(x * x, axis=-1, keepdims=True) + RMS_EPS)
    xz = xn @ p["in_proj_w"].T
    xp, z = xz[..., :D_INNER], xz[..., D_INNER:]
    pad = jnp.pad(xp, ((0, 0), (D_CONV - 1, 0), (0, 0)))
    xc = sum(pad[:, k:k + L, :] * p["conv_w"][:, k][None, None, :] for k in range(D_CONV))
    xc = xc + p["conv_b"]
    xc = xc * jax.nn.sigmoid(xc)
    dbc = xc @ p["x_proj_w"].T
    delta_r = dbc[..., :DT_RANK]
    Bm = dbc[..., DT_RANK:DT_RANK + D_STATE]
    Cm = dbc[..., DT_RANK + D_STATE:DT_RANK + 2 * D_STATE]
    delta = jax.nn.softplus(delta_r @ p["dt_proj_w"].T + p["dt_proj_b"])
    A = -jnp.exp(p["A_log"])                                  # (D_INNER, S)
    deltaA = jnp.exp(delta[..., None] * A[None, None])        # (B, L, D_INNER, S)
    BX = delta[..., None] * Bm[:, :, None, :] * xc[..., None]
    h = jnp.zeros((B, D_INNER, D_STATE), jnp.float32)
    ys = []
    for t in range(L):
        h = deltaA[:, t] * h + BX[:, t]
        ys.append(jnp.sum(h * Cm[:, t, None, :], axis=-1))
    y = jnp.stack(ys, axis=1) + p["D"] * xc
    out = y * (z * jax.nn.sigmoid(z))
    return out @ p["out_proj_w"].T + x


if __name__ == "__main__":
    key = jax.random.PRNGKey(0)
    k_x, k_p = jax.random.split(key)
    B, L = 2, 8
    x = jax.random.normal(k_x, (B, L, D_MODEL), jnp.float32)
    params = init_params(k_p)

    out = jax.block_until_ready(mamba_forward_pallas(x, params))
    ref = jax.block_until_ready(mamba_forward_reference(x, params))

    assert out.shape == (B, L, D_MODEL)
    # bf16 is used only on MXU matmul operands (f32 accumulation / f32 scan),
    # so a few-per-mille tolerance covers the cast error.
    np.testing.assert_allclose(np.asarray(out), np.asarray(ref), rtol=2e-2, atol=2e-2)
    print("KERNEL_OK")
</pallas_src>

<mosaic_0001>
module attributes {stable_mosaic.version = 11 : i64} {
  func.func @mamba_block_kernel(%arg0: i32, %arg1: i32, %arg2: memref<1x8x128xf32, #tpu.memory_space<vmem>>, %arg3: memref<128x256xbf16, #tpu.memory_space<vmem>>, %arg4: memref<3x128xf32, #tpu.memory_space<vmem>>, %arg5: memref<1x128xf32, #tpu.memory_space<vmem>>, %arg6: memref<128x136xbf16, #tpu.memory_space<vmem>>, %arg7: memref<1x128xf32, #tpu.memory_space<vmem>>, %arg8: memref<1x512xf32, #tpu.memory_space<vmem>>, %arg9: memref<1x128xf32, #tpu.memory_space<vmem>>, %arg10: memref<128x128xbf16, #tpu.memory_space<vmem>>, %arg11: memref<1x8x128xf32, #tpu.memory_space<vmem>>, %arg12: memref<1x512xf32, #tpu.memory_space<vmem>>, %arg13: memref<2x128xf32, #tpu.memory_space<vmem>>, %arg14: memref<8x512xf32, #tpu.memory_space<vmem>>, %arg15: memref<8x512xf32, #tpu.memory_space<vmem>>, %arg16: memref<8x512xf32, #tpu.memory_space<vmem>>) attributes {dimension_semantics = [#tpu.dimension_semantics<parallel>, #tpu.dimension_semantics<arbitrary>], iteration_bounds = array<i64: 2, 1>, scalar_prefetch = 0 : i64, scratch_operands = 5 : i64, tpu.core_type = #tpu.core_type<tc>, window_params = [{transform_indices = @transform_0, window_bounds = array<i64: 1, 8, 128>}, {pipeline_mode = #tpu.pipeline_mode<synchronous>, transform_indices = @transform_1, window_bounds = array<i64: 128, 256>}, {pipeline_mode = #tpu.pipeline_mode<synchronous>, transform_indices = @transform_2, window_bounds = array<i64: 3, 128>}, {pipeline_mode = #tpu.pipeline_mode<synchronous>, transform_indices = @transform_3, window_bounds = array<i64: 1, 128>}, {pipeline_mode = #tpu.pipeline_mode<synchronous>, transform_indices = @transform_4, window_bounds = array<i64: 128, 136>}, {pipeline_mode = #tpu.pipeline_mode<synchronous>, transform_indices = @transform_5, window_bounds = array<i64: 1, 128>}, {pipeline_mode = #tpu.pipeline_mode<synchronous>, transform_indices = @transform_6, window_bounds = array<i64: 1, 512>}, {pipeline_mode = #tpu.pipeline_mode<synchronous>, transform_indices = @transform_7, window_bounds = array<i64: 1, 128>}, {pipeline_mode = #tpu.pipeline_mode<synchronous>, transform_indices = @transform_8, window_bounds = array<i64: 128, 128>}, {transform_indices = @transform_9, window_bounds = array<i64: 1, 8, 128>}]} {
    %c0_i32 = arith.constant 0 : i32
    %0 = arith.cmpi eq, %arg1, %c0_i32 : i32
    %1 = arith.extui %0 : i1 to i32
    %c0_i32_0 = arith.constant 0 : i32
    %2 = arith.cmpi ne, %1, %c0_i32_0 : i32
    scf.if %2 {
      %cst_63 = arith.constant 0.000000e+00 : f32
      %145 = vector.broadcast %cst_63 : f32 to vector<1x512xf32>
      %c0_64 = arith.constant 0 : index
      %c0_65 = arith.constant 0 : index
      %146 = vector.load %arg12[%c0_64, %c0_65] : memref<1x512xf32, #tpu.memory_space<vmem>>, vector<1x512xf32>
      tpu.vector_store %arg12[%c0_64, %c0_65], %145 {strides = array<i32>} : memref<1x512xf32, #tpu.memory_space<vmem>>, vector<1x512xf32>,
      %cst_66 = arith.constant 0.000000e+00 : f32
      %147 = vector.broadcast %cst_66 : f32 to vector<2x128xf32>
      %c0_67 = arith.constant 0 : index
      %c0_68 = arith.constant 0 : index
      %148 = vector.load %arg13[%c0_67, %c0_68] : memref<2x128xf32, #tpu.memory_space<vmem>>, vector<2x128xf32>
      tpu.vector_store %arg13[%c0_67, %c0_68], %147 {strides = array<i32>} : memref<2x128xf32, #tpu.memory_space<vmem>>, vector<2x128xf32>,
    } else {
    }
    %c0 = arith.constant 0 : index
    %c0_1 = arith.constant 0 : index
    %c0_2 = arith.constant 0 : index
    %3 = vector.load %arg2[%c0, %c0_1, %c0_2] : memref<1x8x128xf32, #tpu.memory_space<vmem>>, vector<1x8x128xf32>
    %4 = vector.shape_cast %3 : vector<1x8x128xf32> to vector<8x128xf32>
    %5 = arith.mulf %4, %4 : vector<8x128xf32>
    %cst = arith.constant dense<0.000000e+00> : vector<8xf32>
    %6 = vector.multi_reduction <add>, %5, %cst [1] : vector<8x128xf32> to vector<8xf32>
    %7 = vector.shape_cast %6 : vector<8xf32> to vector<8x1xf32>
    %cst_3 = arith.constant 1.280000e+02 : f32
    %8 = vector.broadcast %cst_3 : f32 to vector<8x1xf32>
    %9 = arith.divf %7, %8 : vector<8x1xf32>
    %cst_4 = arith.constant 9.99999974E-6 : f32
    %10 = vector.broadcast %cst_4 : f32 to vector<8x1xf32>
    %11 = arith.addf %9, %10 : vector<8x1xf32>
    %12 = math.rsqrt %11 : vector<8x1xf32>
    %13 = vector.broadcast %12 : vector<8x1xf32> to vector<8x128xf32>
    %14 = arith.mulf %4, %13 : vector<8x128xf32>
    %15 = arith.truncf %14 : vector<8x128xf32> to vector<8x128xbf16>
    %c0_5 = arith.constant 0 : index
    %c0_6 = arith.constant 0 : index
    %16 = vector.load %arg3[%c0_5, %c0_6] : memref<128x256xbf16, #tpu.memory_space<vmem>>, vector<128x256xbf16>
    %cst_7 = arith.constant dense<0.000000e+00> : vector<8x256xf32>
    %17 = tpu.matmul %15, %16, %cst_7 {dimension_numbers = #tpu.dot_dimension_numbers<[1], [0], [0], [1], [0, 0, 1, 1], [], []>} : vector<8x128xbf16>, vector<128x256xbf16>, vector<8x256xf32> -> vector<8x256xf32>
    %18 = vector.extract_strided_slice %17 {offsets = [0, 0], sizes = [8, 128], strides = [1, 1]} : vector<8x256xf32> to vector<8x128xf32>
    %19 = vector.extract_strided_slice %17 {offsets = [0, 128], sizes = [8, 128], strides = [1, 1]} : vector<8x256xf32> to vector<8x128xf32>
    %c0_8 = arith.constant 0 : index
    %c0_9 = arith.constant 0 : index
    %20 = vector.load %arg13[%c0_8, %c0_9] : memref<2x128xf32, #tpu.memory_space<vmem>>, vector<2x128xf32>
    %21 = vector.extract_strided_slice %18 {offsets = [6, 0], sizes = [2, 128], strides = [1, 1]} : vector<8x128xf32> to vector<2x128xf32>
    %c0_10 = arith.constant 0 : index
    %c0_11 = arith.constant 0 : index
    %22 = vector.load %arg13[%c0_10, %c0_11] : memref<2x128xf32, #tpu.memory_space<vmem>>, vector<2x128xf32>
    tpu.vector_store %arg13[%c0_10, %c0_11], %21 {strides = array<i32>} : memref<2x128xf32, #tpu.memory_space<vmem>>, vector<2x128xf32>,
    %23 = tpu.concatenate %20, %18 in 0 : vector<2x128xf32>, vector<8x128xf32> -> vector<10x128xf32>
    %c0_12 = arith.constant 0 : index
    %c0_13 = arith.constant 0 : index
    %24 = vector.load %arg4[%c0_12, %c0_13] : memref<3x128xf32, #tpu.memory_space<vmem>>, vector<3x128xf32>
    %25 = vector.extract_strided_slice %23 {offsets = [0, 0], sizes = [8, 128], strides = [1, 1]} : vector<10x128xf32> to vector<8x128xf32>
    %26 = vector.extract_strided_slice %24 {offsets = [0, 0], sizes = [1, 128], strides = [1, 1]} : vector<3x128xf32> to vector<1x128xf32>
    %27 = vector.broadcast %26 : vector<1x128xf32> to vector<8x128xf32>
    %28 = arith.mulf %25, %27 : vector<8x128xf32>
    %29 = vector.extract_strided_slice %23 {offsets = [1, 0], sizes = [8, 128], strides = [1, 1]} : vector<10x128xf32> to vector<8x128xf32>
    %30 = vector.extract_strided_slice %24 {offsets = [1, 0], sizes = [1, 128], strides = [1, 1]} : vector<3x128xf32> to vector<1x128xf32>
    %31 = vector.broadcast %30 : vector<1x128xf32> to vector<8x128xf32>
    %32 = arith.mulf %29, %31 : vector<8x128xf32>
    %33 = arith.addf %28, %32 : vector<8x128xf32>
    %34 = vector.extract_strided_slice %23 {offsets = [2, 0], sizes = [8, 128], strides = [1, 1]} : vector<10x128xf32> to vector<8x128xf32>
    %35 = vector.extract_strided_slice %24 {offsets = [2, 0], sizes = [1, 128], strides = [1, 1]} : vector<3x128xf32> to vector<1x128xf32>
    %36 = vector.broadcast %35 : vector<1x128xf32> to vector<8x128xf32>
    %37 = arith.mulf %34, %36 : vector<8x128xf32>
    %38 = arith.addf %33, %37 : vector<8x128xf32>
    %c0_14 = arith.constant 0 : index
    %c0_15 = arith.constant 0 : index
    %39 = vector.load %arg5[%c0_14, %c0_15] : memref<1x128xf32, #tpu.memory_space<vmem>>, vector<1x128xf32>
    %40 = vector.broadcast %39 : vector<1x128xf32> to vector<8x128xf32>
    %41 = arith.addf %38, %40 : vector<8x128xf32>
    %42 = arith.negf %41 : vector<8x128xf32>
    %43 = math.exp %42 : vector<8x128xf32>
    %cst_16 = arith.constant 1.000000e+00 : f32
    %44 = vector.broadcast %cst_16 : f32 to vector<8x128xf32>
    %45 = arith.addf %44, %43 : vector<8x128xf32>
    %46 = arith.divf %44, %45 : vector<8x128xf32>
    %47 = arith.mulf %41, %46 : vector<8x128xf32>
    %48 = arith.truncf %47 : vector<8x128xf32> to vector<8x128xbf16>
    %c0_17 = arith.constant 0 : index
    %c0_18 = arith.constant 0 : index
    %49 = vector.load %arg6[%c0_17, %c0_18] : memref<128x136xbf16, #tpu.memory_space<vmem>>, vector<128x136xbf16>
    %cst_19 = arith.constant dense<0.000000e+00> : vector<8x136xf32>
    %50 = tpu.matmul %48, %49, %cst_19 {dimension_numbers = #tpu.dot_dimension_numbers<[1], [0], [0], [1], [0, 0, 1, 1], [], []>} : vector<8x128xbf16>, vector<128x136xbf16>, vector<8x136xf32> -> vector<8x136xf32>
    %51 = vector.extract_strided_slice %50 {offsets = [0, 0], sizes = [8, 128], strides = [1, 1]} : vector<8x136xf32> to vector<8x128xf32>
    %c0_20 = arith.constant 0 : index
    %c0_21 = arith.constant 0 : index
    %52 = vector.load %arg7[%c0_20, %c0_21] : memref<1x128xf32, #tpu.memory_space<vmem>>, vector<1x128xf32>
    %53 = vector.broadcast %52 : vector<1x128xf32> to vector<8x128xf32>
    %54 = arith.addf %51, %53 : vector<8x128xf32>
    %55 = vector.extract_strided_slice %50 {offsets = [0, 128], sizes = [8, 4], strides = [1, 1]} : vector<8x136xf32> to vector<8x4xf32>
    %56 = vector.extract_strided_slice %50 {offsets = [0, 132], sizes = [8, 4], strides = [1, 1]} : vector<8x136xf32> to vector<8x4xf32>
    %cst_22 = arith.constant 2.000000e+01 : f32
    %57 = vector.broadcast %cst_22 : f32 to vector<8x128xf32>
    %58 = arith.cmpf ogt, %54, %57 : vector<8x128xf32>
    %cst_23 = arith.constant 2.000000e+01 : f32
    %59 = vector.broadcast %cst_23 : f32 to vector<8x128xf32>
    %60 = arith.minimumf %54, %59 : vector<8x128xf32>
    %61 = math.exp %60 : vector<8x128xf32>
    %cst_24 = arith.constant 1.000000e+00 : f32
    %62 = vector.broadcast %cst_24 : f32 to vector<8x128xf32>
    %63 = arith.addf %62, %61 : vector<8x128xf32>
    %64 = math.log %63 : vector<8x128xf32>
    %65 = arith.select %58, %54, %64 : vector<8x128xi1>, vector<8x128xf32>
    %66 = arith.mulf %65, %47 : vector<8x128xf32>
    %c0_25 = arith.constant 0 : index
    %c0_26 = arith.constant 0 : index
    %67 = vector.load %arg8[%c0_25, %c0_26] : memref<1x512xf32, #tpu.memory_space<vmem>>, vector<1x128xf32>
    %68 = vector.broadcast %67 : vector<1x128xf32> to vector<8x128xf32>
    %69 = arith.mulf %65, %68 : vector<8x128xf32>
    %70 = math.exp %69 : vector<8x128xf32>
    %c0_27 = arith.constant 0 : index
    %c0_28 = arith.constant 0 : index
    %71 = vector.load %arg14[%c0_27, %c0_28] : memref<8x512xf32, #tpu.memory_space<vmem>>, vector<8x128xf32>
    tpu.vector_store %arg14[%c0_27, %c0_28], %70 {strides = array<i32>} : memref<8x512xf32, #tpu.memory_space<vmem>>, vector<8x128xf32>,
    %72 = vector.extract_strided_slice %55 {offsets = [0, 0], sizes = [8, 1], strides = [1, 1]} : vector<8x4xf32> to vector<8x1xf32>
    %73 = vector.broadcast %72 : vector<8x1xf32> to vector<8x128xf32>
    %74 = arith.mulf %66, %73 : vector<8x128xf32>
    %c0_29 = arith.constant 0 : index
    %c0_30 = arith.constant 0 : index
    %75 = vector.load %arg15[%c0_29, %c0_30] : memref<8x512xf32, #tpu.memory_space<vmem>>, vector<8x128xf32>
    tpu.vector_store %arg15[%c0_29, %c0_30], %74 {strides = array<i32>} : memref<8x512xf32, #tpu.memory_space<vmem>>, vector<8x128xf32>,
    %c0_31 = arith.constant 0 : index
    %c128 = arith.constant 128 : index
    %76 = vector.load %arg8[%c0_31, %c128] : memref<1x512xf32, #tpu.memory_space<vmem>>, vector<1x128xf32>
    %77 = vector.broadcast %76 : vector<1x128xf32> to vector<8x128xf32>
    %78 = arith.mulf %65, %77 : vector<8x128xf32>
    %79 = math.exp %78 : vector<8x128xf32>
    %c0_32 = arith.constant 0 : index
    %c128_33 = arith.constant 128 : index
    %80 = vector.load %arg14[%c0_32, %c128_33] : memref<8x512xf32, #tpu.memory_space<vmem>>, vector<8x128xf32>
    tpu.vector_store %arg14[%c0_32, %c128_33], %79 {strides = array<i32>} : memref<8x512xf32, #tpu.memory_space<vmem>>, vector<8x128xf32>,
    %81 = vector.extract_strided_slice %55 {offsets = [0, 1], sizes = [8, 1], strides = [1, 1]} : vector<8x4xf32> to vector<8x1xf32>
    %82 = vector.broadcast %81 : vector<8x1xf32> to vector<8x128xf32>
    %83 = arith.mulf %66, %82 : vector<8x128xf32>
    %c0_34 = arith.constant 0 : index
    %c128_35 = arith.constant 128 : index
    %84 = vector.load %arg15[%c0_34, %c128_35] : memref<8x512xf32, #tpu.memory_space<vmem>>, vector<8x128xf32>
    tpu.vector_store %arg15[%c0_34, %c128_35], %83 {strides = array<i32>} : memref<8x512xf32, #tpu.memory_space<vmem>>, vector<8x128xf32>,
    %c0_36 = arith.constant 0 : index
    %c256 = arith.constant 256 : index
    %85 = vector.load %arg8[%c0_36, %c256] : memref<1x512xf32, #tpu.memory_space<vmem>>, vector<1x128xf32>
    %86 = vector.broadcast %85 : vector<1x128xf32> to vector<8x128xf32>
    %87 = arith.mulf %65, %86 : vector<8x128xf32>
    %88 = math.exp %87 : vector<8x128xf32>
    %c0_37 = arith.constant 0 : index
    %c256_38 = arith.constant 256 : index
    %89 = vector.load %arg14[%c0_37, %c256_38] : memref<8x512xf32, #tpu.memory_space<vmem>>, vector<8x128xf32>
    tpu.vector_store %arg14[%c0_37, %c256_38], %88 {strides = array<i32>} : memref<8x512xf32, #tpu.memory_space<vmem>>, vector<8x128xf32>,
    %90 = vector.extract_strided_slice %55 {offsets = [0, 2], sizes = [8, 1], strides = [1, 1]} : vector<8x4xf32> to vector<8x1xf32>
    %91 = vector.broadcast %90 : vector<8x1xf32> to vector<8x128xf32>
    %92 = arith.mulf %66, %91 : vector<8x128xf32>
    %c0_39 = arith.constant 0 : index
    %c256_40 = arith.constant 256 : index
    %93 = vector.load %arg15[%c0_39, %c256_40] : memref<8x512xf32, #tpu.memory_space<vmem>>, vector<8x128xf32>
    tpu.vector_store %arg15[%c0_39, %c256_40], %92 {strides = array<i32>} : memref<8x512xf32, #tpu.memory_space<vmem>>, vector<8x128xf32>,
    %c0_41 = arith.constant 0 : index
    %c384 = arith.constant 384 : index
    %94 = vector.load %arg8[%c0_41, %c384] : memref<1x512xf32, #tpu.memory_space<vmem>>, vector<1x128xf32>
    %95 = vector.broadcast %94 : vector<1x128xf32> to vector<8x128xf32>
    %96 = arith.mulf %65, %95 : vector<8x128xf32>
    %97 = math.exp %96 : vector<8x128xf32>
    %c0_42 = arith.constant 0 : index
    %c384_43 = arith.constant 384 : index
    %98 = vector.load %arg14[%c0_42, %c384_43] : memref<8x512xf32, #tpu.memory_space<vmem>>, vector<8x128xf32>
    tpu.vector_store %arg14[%c0_42, %c384_43], %97 {strides = array<i32>} : memref<8x512xf32, #tpu.memory_space<vmem>>, vector<8x128xf32>,
    %99 = vector.extract_strided_slice %55 {offsets = [0, 3], sizes = [8, 1], strides = [1, 1]} : vector<8x4xf32> to vector<8x1xf32>
    %100 = vector.broadcast %99 : vector<8x1xf32> to vector<8x128xf32>
    %101 = arith.mulf %66, %100 : vector<8x128xf32>
    %c0_44 = arith.constant 0 : index
    %c384_45 = arith.constant 384 : index
    %102 = vector.load %arg15[%c0_44, %c384_45] : memref<8x512xf32, #tpu.memory_space<vmem>>, vector<8x128xf32>
    tpu.vector_store %arg15[%c0_44, %c384_45], %101 {strides = array<i32>} : memref<8x512xf32, #tpu.memory_space<vmem>>, vector<8x128xf32>,
    %c0_46 = arith.constant 0 : index
    %c0_47 = arith.constant 0 : index
    %103 = vector.load %arg12[%c0_46, %c0_47] : memref<1x512xf32, #tpu.memory_space<vmem>>, vector<1x512xf32>
    %c0_i32_48 = arith.constant 0 : i32
    %c8_i32 = arith.constant 8 : i32
    %104 = arith.addi %c0_i32_48, %c8_i32 : i32
    %c1_i32 = arith.constant 1 : i32
    %105 = scf.for %arg17 = %c0_i32_48 to %104 step %c1_i32 iter_args(%arg18 = %103) -> (vector<1x512xf32>)  : i32 {
      %145 = arith.index_cast %arg17 : i32 to index
      %c0_63 = arith.constant 0 : index
      %146 = vector.load %arg14[%145, %c0_63] : memref<8x512xf32, #tpu.memory_space<vmem>>, vector<1x512xf32>
      %147 = arith.mulf %146, %arg18 : vector<1x512xf32>
      %148 = arith.index_cast %arg17 : i32 to index
      %c0_64 = arith.constant 0 : index
      %149 = vector.load %arg15[%148, %c0_64] : memref<8x512xf32, #tpu.memory_space<vmem>>, vector<1x512xf32>
      %150 = arith.addf %147, %149 : vector<1x512xf32>
      %151 = arith.index_cast %arg17 : i32 to index
      %c0_65 = arith.constant 0 : index
      %152 = vector.load %arg16[%151, %c0_65] : memref<8x512xf32, #tpu.memory_space<vmem>>, vector<1x512xf32>
      tpu.vector_store %arg16[%151, %c0_65], %150 {strides = array<i32>} : memref<8x512xf32, #tpu.memory_space<vmem>>, vector<1x512xf32>,
      scf.yield %150 : vector<1x512xf32>
    }
    %c8_i32_49 = arith.constant 8 : i32
    %c0_50 = arith.constant 0 : index
    %c0_51 = arith.constant 0 : index
    %106 = vector.load %arg12[%c0_50, %c0_51] : memref<1x512xf32, #tpu.memory_space<vmem>>, vector<1x512xf32>
    tpu.vector_store %arg12[%c0_50, %c0_51], %105 {strides = array<i32>} : memref<1x512xf32, #tpu.memory_space<vmem>>, vector<1x512xf32>,
    %c0_52 = arith.constant 0 : index
    %c0_53 = arith.constant 0 : index
    %107 = vector.load %arg16[%c0_52, %c0_53] : memref<8x512xf32, #tpu.memory_space<vmem>>, vector<8x512xf32>
    %c0_54 = arith.constant 0 : index
    %c0_55 = arith.constant 0 : index
    %108 = vector.load %arg9[%c0_54, %c0_55] : memref<1x128xf32, #tpu.memory_space<vmem>>, vector<1x128xf32>
    %109 = vector.broadcast %108 : vector<1x128xf32> to vector<8x128xf32>
    %110 = arith.mulf %109, %47 : vector<8x128xf32>
    %111 = vector.extract_strided_slice %107 {offsets = [0, 0], sizes = [8, 128], strides = [1, 1]} : vector<8x512xf32> to vector<8x128xf32>
    %112 = vector.extract_strided_slice %56 {offsets = [0, 0], sizes = [8, 1], strides = [1, 1]} : vector<8x4xf32> to vector<8x1xf32>
    %113 = vector.broadcast %112 : vector<8x1xf32> to vector<8x128xf32>
    %114 = arith.mulf %111, %113 : vector<8x128xf32>
    %115 = arith.addf %110, %114 : vector<8x128xf32>
    %116 = vector.extract_strided_slice %107 {offsets = [0, 128], sizes = [8, 128], strides = [1, 1]} : vector<8x512xf32> to vector<8x128xf32>
    %117 = vector.extract_strided_slice %56 {offsets = [0, 1], sizes = [8, 1], strides = [1, 1]} : vector<8x4xf32> to vector<8x1xf32>
    %118 = vector.broadcast %117 : vector<8x1xf32> to vector<8x128xf32>
    %119 = arith.mulf %116, %118 : vector<8x128xf32>
    %120 = arith.addf %115, %119 : vector<8x128xf32>
    %121 = vector.extract_strided_slice %107 {offsets = [0, 256], sizes = [8, 128], strides = [1, 1]} : vector<8x512xf32> to vector<8x128xf32>
    %122 = vector.extract_strided_slice %56 {offsets = [0, 2], sizes = [8, 1], strides = [1, 1]} : vector<8x4xf32> to vector<8x1xf32>
    %123 = vector.broadcast %122 : vector<8x1xf32> to vector<8x128xf32>
    %124 = arith.mulf %121, %123 : vector<8x128xf32>
    %125 = arith.addf %120, %124 : vector<8x128xf32>
    %126 = vector.extract_strided_slice %107 {offsets = [0, 384], sizes = [8, 128], strides = [1, 1]} : vector<8x512xf32> to vector<8x128xf32>
    %127 = vector.extract_strided_slice %56 {offsets = [0, 3], sizes = [8, 1], strides = [1, 1]} : vector<8x4xf32> to vector<8x1xf32>
    %128 = vector.broadcast %127 : vector<8x1xf32> to vector<8x128xf32>
    %129 = arith.mulf %126, %128 : vector<8x128xf32>
    %130 = arith.addf %125, %129 : vector<8x128xf32>
    %131 = arith.negf %19 : vector<8x128xf32>
    %132 = math.exp %131 : vector<8x128xf32>
    %cst_56 = arith.constant 1.000000e+00 : f32
    %133 = vector.broadcast %cst_56 : f32 to vector<8x128xf32>
    %134 = arith.addf %133, %132 : vector<8x128xf32>
    %135 = arith.divf %133, %134 : vector<8x128xf32>
    %136 = arith.mulf %19, %135 : vector<8x128xf32>
    %137 = arith.mulf %130, %136 : vector<8x128xf32>
    %138 = arith.truncf %137 : vector<8x128xf32> to vector<8x128xbf16>
    %c0_57 = arith.constant 0 : index
    %c0_58 = arith.constant 0 : index
    %139 = vector.load %arg10[%c0_57, %c0_58] : memref<128x128xbf16, #tpu.memory_space<vmem>>, vector<128x128xbf16>
    %cst_59 = arith.constant dense<0.000000e+00> : vector<8x128xf32>
    %140 = tpu.matmul %138, %139, %cst_59 {dimension_numbers = #tpu.dot_dimension_numbers<[1], [0], [0], [1], [0, 0, 1, 1], [], []>} : vector<8x128xbf16>, vector<128x128xbf16>, vector<8x128xf32> -> vector<8x128xf32>
    %141 = arith.addf %4, %140 : vector<8x128xf32>
    %c0_60 = arith.constant 0 : index
    %c0_61 = arith.constant 0 : index
    %c0_62 = arith.constant 0 : index
    %142 = vector.load %arg11[%c0_60, %c0_61, %c0_62] : memref<1x8x128xf32, #tpu.memory_space<vmem>>, vector<1x8x128xf32>
    %143 = vector.shape_cast %142 : vector<1x8x128xf32> to vector<8x128xf32>
    %144 = vector.shape_cast %141 : vector<8x128xf32> to vector<1x8x128xf32>
    tpu.vector_store %arg11[%c0_60, %c0_61, %c0_62], %144 {strides = array<i32>} : memref<1x8x128xf32, #tpu.memory_space<vmem>>, vector<1x8x128xf32>,
    return
  }
  func.func @transform_0(%arg0: i32, %arg1: i32) -> (i32, i32, i32) {
    %c0_i32 = arith.constant 0 : i32
    %c0_i32_0 = arith.constant 0 : i32
    return %arg0, %arg1, %c0_i32 : i32, i32, i32
  }
  func.func @transform_1(%arg0: i32, %arg1: i32) -> (i32, i32) {
    %c0_i32 = arith.constant 0 : i32
    %c0_i32_0 = arith.constant 0 : i32
    %c0_i32_1 = arith.constant 0 : i32
    return %c0_i32, %c0_i32_0 : i32, i32
  }
  func.func @transform_2(%arg0: i32, %arg1: i32) -> (i32, i32) {
    %c0_i32 = arith.constant 0 : i32
    %c0_i32_0 = arith.constant 0 : i32
    %c0_i32_1 = arith.constant 0 : i32
    return %c0_i32, %c0_i32_0 : i32, i32
  }
  func.func @transform_3(%arg0: i32, %arg1: i32) -> (i32, i32) {
    %c0_i32 = arith.constant 0 : i32
    %c0_i32_0 = arith.constant 0 : i32
    %c0_i32_1 = arith.constant 0 : i32
    return %c0_i32, %c0_i32_0 : i32, i32
  }
  func.func @transform_4(%arg0: i32, %arg1: i32) -> (i32, i32) {
    %c0_i32 = arith.constant 0 : i32
    %c0_i32_0 = arith.constant 0 : i32
    %c0_i32_1 = arith.constant 0 : i32
    return %c0_i32, %c0_i32_0 : i32, i32
  }
  func.func @transform_5(%arg0: i32, %arg1: i32) -> (i32, i32) {
    %c0_i32 = arith.constant 0 : i32
    %c0_i32_0 = arith.constant 0 : i32
    %c0_i32_1 = arith.constant 0 : i32
    return %c0_i32, %c0_i32_0 : i32, i32
  }
  func.func @transform_6(%arg0: i32, %arg1: i32) -> (i32, i32) {
    %c0_i32 = arith.constant 0 : i32
    %c0_i32_0 = arith.constant 0 : i32
    %c0_i32_1 = arith.constant 0 : i32
    return %c0_i32, %c0_i32_0 : i32, i32
  }
  func.func @transform_7(%arg0: i32, %arg1: i32) -> (i32, i32) {
    %c0_i32 = arith.constant 0 : i32
    %c0_i32_0 = arith.constant 0 : i32
    %c0_i32_1 = arith.constant 0 : i32
    return %c0_i32, %c0_i32_0 : i32, i32
  }
  func.func @transform_8(%arg0: i32, %arg1: i32) -> (i32, i32) {
    %c0_i32 = arith.constant 0 : i32
    %c0_i32_0 = arith.constant 0 : i32
    %c0_i32_1 = arith.constant 0 : i32
    return %c0_i32, %c0_i32_0 : i32, i32
  }
  func.func @transform_9(%arg0: i32, %arg1: i32) -> (i32, i32, i32) {
    %c0_i32 = arith.constant 0 : i32
    %c0_i32_0 = arith.constant 0 : i32
    return %arg0, %arg1, %c0_i32 : i32, i32, i32
  }
}

</mosaic_0001>

<bundles_post_ra>
// kernel: tpu_custom_call.1
= control target key start
LH: loop header
LB: loop body
LE: loop exit
PB: predicated region body
PF: predicated region fallthrough
CT: control target
= control target key end

     0   :  { %14 = vsyncpa [#allocation8], 0  ;;  %s1905_s0 = inlined_call_operand.hbm [shape: f32[2,8,128], index: 0, kind: input, shape index: {}]   ;;  %s1906_s1 = inlined_call_operand.vmem [shape: bf16[128,256], index: 1, kind: input, shape index: {}]   ;;  %s1907_s2 = inlined_call_operand.vmem [shape: f32[3,128], index: 2, kind: input, shape index: {}]   ;;  %s1908_s3 = inlined_call_operand.vmem [shape: f32[1,128], index: 3, kind: input, shape index: {}]   ;;  %s1909_s4 = inlined_call_operand.vmem [shape: bf16[128,136], index: 4, kind: input, shape index: {}]   ;;  %s1910_s5 = inlined_call_operand.vmem [shape: f32[1,128], index: 5, kind: input, shape index: {}]   ;;  %s1911_s6 = inlined_call_operand.vmem [shape: f32[1,512], index: 6, kind: input, shape index: {}]   ;;  %s1912_s7 = inlined_call_operand.vmem [shape: f32[1,128], index: 7, kind: input, shape index: {}]   ;;  %s1913_s8 = inlined_call_operand.vmem [shape: bf16[128,128], index: 8, kind: input, shape index: {}]   ;;  %s1914_s9 = inlined_call_operand.hbm [shape: f32[2,8,128], index: 9, kind: output, shape index: {}]  }
   0x1   :  { %16 = vsyncpa [#allocation8 + $0x1], 0 }
   0x2   :  { %17 = vsyncpa [#allocation9], 0 }
   0x3   :  { %19 = vsyncpa [#allocation9 + $0x1], 0  ;;  %s1557_s30 = smov 0   ;;  %s1559_s10 = smov 0  }
   0x4   :  { %s1561_s11 = smov 0   ;;  %s1563_s12 = smov 0  }
   0x5   :  { %s1565_s13 = smov 0   ;;  %s1567_s14 = smov 0  }
   0x6 LB: > { %s1099_s15 = sadd.s32 4294967295, %s1485_s14   ;;  %s1100_s16 = sadd.s32 4294967294, %s1485_s14   ;;  %s1485_s14 = sphi %s1567_s14, %s25_s14   ;;  %s1481_s13 = sphi %s1565_s13, %s1933_s13   ;;  %s1477_s12 = sphi %s1563_s12, %s1932_s12   ;;  %s1473_s11 = sphi %s1561_s11, %s1931_s11   ;;  %s1469_s10 = sphi %s1559_s10, %s1930_s10   ;;  %s1465_s30 = sphi %s1557_s30, %s1929_s30  }
   0x7   : > { %s37_s17 = sadd.s32 1, %s1481_s13  ;;  %s46_s18 = sadd.s32 1, %s1473_s11 }
   0x8   : > { %p39_p0 = scmp.ge.s32.totalorder %s37_s17, 2  ;;  %p53_p1 = scmp.ne.s32.totalorder %s1473_s11, %s1469_s10 }
   0x9   : > { %p54_p2 = scmp.eq.s32.totalorder %s1485_s14, 0  ;;  %p59_p3 = scmp.ne.s32.totalorder %s1469_s10, %s1465_s30 }
   0xa   : > { %s1935_s17 = smov (%p39_p0, %s37_s17), 0  ;;  %p60_p5 = scmp.eq.s32.totalorder %s1099_s15, 0 }
   0xb   : > { %1916 = sst [smem:[#allocation13_spill]] %s1935_s17  ;;  %p1598_p4 = por %p54_p2, %p53_p1 }
   0xc   : > { %s41_s20 = ssub.s32 %s1481_s13, %s1935_s17  ;;  %p253_p6 = scmp.eq.s32.totalorder %s1099_s15, 1 }
   0xd   : > { %p44_p7 = scmp.eq.s32.totalorder %s41_s20, 0  ;;  %p1604_p8 = por %p60_p5, %p59_p3 }
   0xe   : > { %p1608_p9 = por %p253_p6, %p53_p1  ;;  %p259_p10 = scmp.eq.s32.totalorder %s1100_s16, 1 }
   0xf   : > { %s1613_s23 = scalar_select %p44_p7, %s1473_s11, %s46_s18  }
  0x10   : > { %p1615_p11 = por %p259_p10, %p59_p3  ;;  %p1205_p13 = scmp.lt.s32.totalorder %s1485_s14, 2 }
  0x11   : > { %1920 = sst [smem:[#allocation14_spill]] %s1613_s23  ;;  %s303_s25 = sand.u32 1, %s1473_s11  }
  0x12   : > { %s1921_s24 = scalar_select %p1615_p11, 1, 0 }
  0x13   : > { %s1103_s26 = sshll.u32 %s303_s25, 3  ;;  %s1104_s27 = sshll.u32 %s1481_s13, 7 }
  0x14   : > { %s313_s15 = scalar_lea.hbm %s1905_s0, %s1104_s27  ;;  %s307_s20 = scalar_lea.vmem [#allocation7], %s1103_s26 }
  0x15   : > { %s315_s17 = sshll.u32 %s307_s20, 4  ;;  %p1628_p0 = pnand %p1205_p13, %p1598_p4  ;;  %s316_s17 = int_to_ptr.vmem [resolvable:$true] %s315_s17 }
  0x16   : > { %p1105_p1 = scmp.ge.s32.totalorder %s1485_s14, 1  ;;  %p320_p2 = scmp.lt.s32.totalorder %s1485_s14, 3 }
  0x17   : > { %s304_s18 = scalar_lea.sflag [#allocation8], %s303_s25  ;;  %p1371_p3 = pneg %p1628_p0 }
  0x18   : > { %s1382_s23 = scalar_lea.vmem %s316_s17, 128  ;;  %s1495_s28 = smov [#allocation7]  }
  0x19   : > { %p1383_p5 = scmp.ne.s32.totalorder %s316_s17, %s1382_s23  ;;  %s1387_s27 = sshll.u32 %s1495_s28, 4  ;;  %s1388_s27 = int_to_ptr.vmem [resolvable:$false] %s1387_s27 }
  0x1a   : > { %s1389_s26 = scalar_lea.vmem %s1388_s27, 256  ;;  %p1390_p10 = scmp.lt.s32.totalorder %s316_s17, %s1388_s27 }
  0x1b   : > { %p1385_p6 = pnand %p1383_p5, %p1371_p3  ;;  %p1391_p12 = scmp.lt.s32.totalorder %s1389_s26, %s1382_s23 }
  0x1d   : > { %p1386_p7 = pneg %p1385_p6  ;;  %p1392_p4 = por %p1391_p12, %p1390_p10 }
  0x1f   : > { %p1393_p13 = pnand %p1392_p4, %p1386_p7 }
  0x21   : > { %1396 = shalt.err (!%p1393_p13)
}
  0x22   : > { %1200 = dma.hbm_to_vmem [thread:$0]  (!%p1628_p0), %s313_s15, 128, %s316_s17, %s304_s18  }
  0x23   : > { %p321_p11 = pnand %p1105_p1, %p320_p2 }
  0x24   : > { %s1643_s19 = sand.u32 (!%p321_p11), 1, %s1469_s10  }
  0x25   : > { %324 = sbr.rel (%p321_p11) target bundleno = 1136 (0x470), region = 56  ;;  %s1106_s23 = sshll.u32 (!%p321_p11), %s1643_s19, 3 }
  0x26   : > { %s327_s25 = scalar_lea.sflag (!%p321_p11), [#allocation8], %s1643_s19  ;;  %s330_s29 = scalar_lea.vmem (!%p321_p11), [#allocation7], %s1106_s23 }
  0x2a   : > { %1456 = dma.done.wait (%p1604_p8), %s327_s25, 128  }
  0x2b   : > { %1458 = vsyncadd (%p1604_p8), %s327_s25, 4294967168  ;;  %v1653_v0 = vld [vmem:[%s330_s29] sm:$0xff]  ;;  %v1496_v14 = vmov 0   ;;  %v370_v19 = vlaneseq  ;;  %v1497_v20 = vmov 0.0   ;;  %v530_v48 = vld [vmem:[%s1907_s2] sm:$0x7] }
  0x2c   : > { %v377_v1 = vmul.f32 %v1653_v0, %v1653_v0  ;;  %v1286_v2 = vld [vmem:[%s1906_s1 + $0x74] ss:$8 sps:$4 sm:$0xff]   ;;  %v1288_v3 = vld [vmem:[%s1906_s1 + $0x70] ss:$8 sps:$4 sm:$0xff]   ;;  %v1289_v4 = vld [vmem:[%s1906_s1 + $0x64] ss:$8 sps:$4 sm:$0xff]   ;;  %514 = vmatprep.mubr.bf16.mxu0 %v1496_v14  ;;  %708 = vmatprep.mubr.bf16.mxu1 %v1496_v14 }
  0x2d   : > { %482 = vmatprep.subr.bf16.mxu0 %v1286_v2  ;;  %v1291_v5 = vld [vmem:[%s1906_s1 + $0x60] ss:$8 sps:$4 sm:$0xff]   ;;  %v1292_v6 = vld [vmem:[%s1906_s1 + $0x54] ss:$8 sps:$4 sm:$0xff]   ;;  %v1294_v7 = vld [vmem:[%s1906_s1 + $0x50] ss:$8 sps:$4 sm:$0xff]   ;;  %1281 = vset.pattern.permute.xlu0 %v1496_v14 }
  0x2e   : > { %378 = vadd.xlane.f32.xlu0 %v377_v1  ;;  %483 = vmatpush1.bf16.msra.mxu0 %v1288_v3  ;;  %v1295_v8 = vld [vmem:[%s1906_s1 + $0x44] ss:$8 sps:$4 sm:$0xff]   ;;  %v1297_v9 = vld [vmem:[%s1906_s1 + $0x40] ss:$8 sps:$4 sm:$0xff]   ;;  %v1298_v10 = vld [vmem:[%s1906_s1 + $0x34] ss:$8 sps:$4 sm:$0xff]  }
  0x2f   : > { %484 = vmatprep.subr.bf16.mxu0 %v1289_v4  ;;  %v1300_v11 = vld [vmem:[%s1906_s1 + $0x30] ss:$8 sps:$4 sm:$0xff]   ;;  %v1301_v12 = vld [vmem:[%s1906_s1 + $0x24] ss:$8 sps:$4 sm:$0xff]   ;;  %v1303_v13 = vld [vmem:[%s1906_s1 + $0x20] ss:$8 sps:$4 sm:$0xff]  }
  0x30   : > { %v1304_v15 = vld [vmem:[%s1906_s1 + $0x14] ss:$8 sps:$4 sm:$0xff]   ;;  %v1306_v16 = vld [vmem:[%s1906_s1 + $0x10] ss:$8 sps:$4 sm:$0xff]   ;;  %v1307_v17 = vld [vmem:[%s1906_s1 + $0x4] ss:$8 sps:$4 sm:$0xff]  }
  0x31   : > { %v1309_v18 = vld [vmem:[%s1906_s1] ss:$8 sps:$4 sm:$0xff]   ;;  %375 = vst [vmem:[#allocation3] sm:$0x3] %v1497_v20  ;;  %vm1706_vm0 = vcmp.lt.s32.totalorder %v370_v19, 512  ;;  %v532_v45 = vshrl.u32 %v370_v19, 7 }
  0x32   : > { %485 = vmatpush1.bf16.msra.mxu0 %v1291_v5  ;;  %374 = vst.msk [vmem:[#allocation2] sm:$0xf] %vm1706_vm0, %v1497_v20  ;;  %v1310_v29 = vld [vmem:[%s1909_s4 + $0x74] ss:$8 sps:$4 sm:$0xff]   ;;  %v1312_v30 = vld [vmem:[%s1909_s4 + $0x70] ss:$8 sps:$4 sm:$0xff]  }
  0x33   : > { %486 = vmatprep.subr.bf16.mxu0 %v1292_v6  ;;  %v1313_v31 = vld [vmem:[%s1909_s4 + $0x64] ss:$8 sps:$4 sm:$0xff]   ;;  %676 = vmatprep.subr.bf16.mxu1 %v1310_v29  ;;  %v1315_v32 = vld [vmem:[%s1909_s4 + $0x60] ss:$8 sps:$4 sm:$0xff]   ;;  %v1316_v33 = vld [vmem:[%s1909_s4 + $0x54] ss:$8 sps:$4 sm:$0xff]  }
  0x34   : > { %677 = vmatpush1.bf16.msra.mxu1 %v1312_v30  ;;  %v1318_v34 = vld [vmem:[%s1909_s4 + $0x50] ss:$8 sps:$4 sm:$0xff]   ;;  %v1319_v35 = vld [vmem:[%s1909_s4 + $0x44] ss:$8 sps:$4 sm:$0xff]   ;;  %v1321_v36 = vld [vmem:[%s1909_s4 + $0x40] ss:$8 sps:$4 sm:$0xff]  }
  0x35   : > { %678 = vmatprep.subr.bf16.mxu1 %v1313_v31  ;;  %v1322_v37 = vld [vmem:[%s1909_s4 + $0x34] ss:$8 sps:$4 sm:$0xff]   ;;  %v1324_v38 = vld [vmem:[%s1909_s4 + $0x30] ss:$8 sps:$4 sm:$0xff]   ;;  %v1325_v39 = vld [vmem:[%s1909_s4 + $0x24] ss:$8 sps:$4 sm:$0xff]  }
  0x36   : > { %487 = vmatpush1.bf16.msra.mxu0 %v1294_v7  ;;  %v1327_v40 = vld [vmem:[%s1909_s4 + $0x20] ss:$8 sps:$4 sm:$0xff]   ;;  %v1328_v41 = vld [vmem:[%s1909_s4 + $0x14] ss:$8 sps:$4 sm:$0xff]   ;;  %v1330_v42 = vld [vmem:[%s1909_s4 + $0x10] ss:$8 sps:$4 sm:$0xff]  }
  0x37   : > { %488 = vmatprep.subr.bf16.mxu0 %v1295_v8  ;;  %v1331_v43 = vld [vmem:[%s1909_s4 + $0x4] ss:$8 sps:$4 sm:$0xff]   ;;  %v1333_v44 = vld [vmem:[%s1909_s4] ss:$8 sps:$4 sm:$0xff]   ;;  %v538_v46 = vsub.s32 1, %v532_v45  ;;  %v552_v47 = vsub.s32 2, %v532_v45 }
  0x38   : > { %679 = vmatpush1.bf16.msra.mxu1 %v1315_v32  ;;  %v523_v49 = vld [vmem:[#allocation3] sm:$0x3]  ;;  %v533_v50 = vsub.s32 0, %v532_v45  ;;  %vm528_vm1 = vcmask 1041408   ;;  %vm544_vm2 = vcmask 1046528   ;;  %vm558_vm3 = vcmask 1045504  }
  0x39   : > { %v1714_v28 = vld [vmem:[#allocation2] sm:$0xf]   ;;  %680 = vmatprep.subr.bf16.mxu1 %v1316_v33  ;;  %v539_v51 = vrot.slane %v530_v48, %v538_v46  ;;  %v553_v52 = vrot.slane %v530_v48, %v552_v47  ;;  %v1499_v30 = vmov 2   ;;  %v1500_v31 = vmov 3   ;;  %s1800_s15 = scalar_lea.vmem [#allocation10], %s1106_s23  ;;  %s1491_s20 = smov 0  }
  0x3a   : > { %489 = vmatpush1.bf16.msra.mxu0 %v1297_v9  ;;  %v534_v57 = vrot.slane %v530_v48, %v533_v50  ;;  %v1124_v9 = vld [vmem:[%s1908_s3] ss:$0 sm:$0xff] }
  0x3b   : > { %490 = vmatprep.subr.bf16.mxu0 %v1298_v10  ;;  %v1142_v19 = vld [vmem:[%s1910_s5] ss:$0 sm:$0xff] }
  0x3c   : > { %681 = vmatpush1.bf16.msra.mxu1 %v1318_v34 }
  0x3d   : > { %682 = vmatprep.subr.bf16.mxu1 %v1319_v35  ;;  %v1143_v35 = vld [vmem:[%s1911_s6] ss:$0 sm:$0xff] }
  0x3e   : > { %491 = vmatpush1.bf16.msra.mxu0 %v1300_v11 }
  0x3f   : > { %492 = vmatprep.subr.bf16.mxu0 %v1301_v12 }
  0x40   : > { %683 = vmatpush1.bf16.msra.mxu1 %v1321_v36  ;;  %v1144_v36 = vld [vmem:[%s1911_s6 + $0x1] ss:$0 sm:$0xff] }
  0x41   : > { %684 = vmatprep.subr.bf16.mxu1 %v1322_v37 }
  0x42   : > { %493 = vmatpush1.bf16.msra.mxu0 %v1303_v13 }
  0x43   : > { %494 = vmatprep.subr.bf16.mxu0 %v1304_v15 }
  0x44   : > { %685 = vmatpush1.bf16.msra.mxu1 %v1324_v38  ;;  %v1145_v38 = vld [vmem:[%s1911_s6 + $0x2] ss:$0 sm:$0xff] }
  0x45   : > { %686 = vmatprep.subr.bf16.mxu1 %v1325_v39  ;;  %v1146_v39 = vld [vmem:[%s1911_s6 + $0x3] ss:$0 sm:$0xff] }
  0x46   : > { %495 = vmatpush1.bf16.msra.mxu0 %v1306_v16 }
  0x47   : > { %496 = vmatprep.subr.bf16.mxu0 %v1307_v17 }
  0x48   : > { %687 = vmatpush1.bf16.msra.mxu1 %v1327_v40 }
  0x49   : > { %688 = vmatprep.subr.bf16.mxu1 %v1328_v41 }
  0x4a   : > { %497 = vmatpush1.bf16.msra.mxu0 %v1309_v18  ;;  %v1498_v18 = vmov 1  }
  0x4b   : > { %1282 = vset.pattern.permute.xlu1 %v1498_v18 }
  0x4c   : > { %689 = vmatpush1.bf16.msra.mxu1 %v1330_v42 }
  0x4d   : > { %690 = vmatprep.subr.bf16.mxu1 %v1331_v43 }
  0x50   : > { %691 = vmatpush1.bf16.msra.mxu1 %v1333_v44 }
  0xb7   : > { %v379_v22 = vpop.xlane.xlu0 %378 }
  0xb8   : > { %v381_v23 = vmul.f32 0.0078125, %v379_v22 }
  0xba   : > { %v382_v24 = vadd.f32 1e-05, %v381_v23 }
  0xbc   : > { %1334 = vrsqrt.f32 %v382_v24 }
  0xc9   : > { %v1335_v25 = vpop.eup %1334 }
  0xca   : > { %v384_v26 = vmul.f32 %v1335_v25, %v1653_v0 }
  0xcc   : > { %v385_v27 = vpack.c.bf16 %v384_v26, %v384_v26 }
  0xce   : > { %515 = vmatmul.mubr.bf16.vlgmr.msra.gmra.mxu0 %v385_v27 }
 0x18e   : > { %v516_v53 = vpop.f32.mrf.mxu0 }
 0x18f   : > { %524 = vst [vmem:[#allocation3 - $0x6] sm:$0xc0] %v516_v53  ;;  %v526_v54 = vrot.slane %v516_v53, 6 }
 0x190   : > { %v1767_v55 = vpop.f32.mrf.mxu0 }
 0x191   : > { %v529_v56 = vsel %vm528_vm1, %v523_v49, %v526_v54  ;;  %v541_v58 = vmul.f32 %v539_v51, %v526_v54  ;;  %v555_v59 = vmul.f32 %v553_v52, %v526_v54 }
 0x192   : > { %v540_v60 = vmul.f32 %v539_v51, %v529_v56  ;;  %v554_v61 = vmul.f32 %v553_v52, %v529_v56  ;;  %v520_v62 = vpop.f32.mrf.mxu0  ;;  %v535_v5 = vmul.f32 %v534_v57, %v529_v56 }
 0x193   : > { %v546_v63 = vrot.slane %v541_v58, 1  ;;  %v560_v3 = vrot.slane %v555_v59, 2 }
 0x194   : > { %v545_v1 = vrot.slane %v540_v60, 1  ;;  %v559_v2 = vrot.slane %v554_v61, 2  ;;  %v521_v4 = vpop.f32.mrf.mxu0 }
 0x196   : > { %v547_v6 = vsel %vm544_vm2, %v545_v1, %v546_v63  ;;  %v561_v8 = vsel %vm558_vm3, %v559_v2, %v560_v3  ;;  %v1487_v63 = vmov %v1714_v28  }
 0x197   : > { %v549_v7 = vadd.f32 %v547_v6, %v535_v5 }
 0x199   : > { %v563_v10 = vadd.f32 %v561_v8, %v549_v7 }
 0x19b   : > { %v571_v11 = vadd.f32 %v1124_v9, %v563_v10 }
 0x19d   : > { %v1125_v12 = vmul.f32 -1.442695, %v571_v11 }
 0x19f   : > { %1336 = vpow2.f32 %v1125_v12 }
 0x1ac   : > { %v1337_v13 = vpop.eup %1336 }
 0x1ad   : > { %v575_v14 = vadd.f32 1.0, %v1337_v13 }
 0x1af   : > { %1338 = vrcp.f32 %v575_v14 }
 0x1bc   : > { %v1339_v15 = vpop.eup %1338 }
 0x1bd   : > { %v1772_v16 = vmul.f32 %v1339_v15, %v571_v11 }
 0x1bf   : > { %v579_v17 = vpack.c.bf16 %v1772_v16, %v1772_v16 }
 0x1c1   : > { %709 = vmatmul.mubr.bf16.vlgmr.msra.gmra.mxu1 %v579_v17 }
 0x281   : > { %v710_v22 = vpop.f32.mrf.mxu1 }
 0x282   : > { %v724_v23 = vadd.f32 %v1142_v19, %v710_v22 }
 0x283   : > { %v1779_v24 = vpop.f32.mrf.mxu1 }
 0x284   : > { %v726_v25 = vmin.f32 %v724_v23, 20.0  ;;  %764 = vperm.xlu1 %1282, %v1779_v24   ;;  %747 = vperm.xlu0 %1281, %v1779_v24   ;;  %vm725_vm4 = vcmp.gt.f32.partialorder %v724_v23, 20.0 }
 0x285   : > { %v714_v26 = vpop.f32.mrf.mxu1 }
 0x286   : > { %v727_v27 = vmul.f32 1.442695, %v726_v25 }
 0x287   : > { %v715_v29 = vpop.f32.mrf.mxu1 }
 0x288   : > { %1340 = vpow2.f32 %v727_v27  ;;  %1283 = vset.pattern.permute.xlu1 %v1499_v30  ;;  %1285 = vset.pattern.permute.xlu0 %v1500_v31 }
 0x289   : > { %781 = vperm.xlu1 %1283, %v1779_v24  }
 0x28d   : > { %1284 = vset.pattern.permute.xlu1 %v1500_v31 }
 0x28e   : > { %798 = vperm.xlu1 %1284, %v1779_v24  }
 0x295   : > { %v1341_v32 = vpop.eup %1340 }
 0x296   : > { %v729_v33 = vadd.f32 1.0, %v1341_v32 }
 0x298   : > { %1342 = vlog2.f32 %v729_v33 }
 0x2a5   : > { %v1343_v34 = vpop.eup %1342 }
 0x2a6   : > { %v731_v37 = vmul.f32 0.6931472, %v1343_v34 }
 0x2a8   : > { %v732_v40 = vsel %vm725_vm4, %v724_v23, %v731_v37 }
 0x2a9   : > { %v741_v41 = vmul.f32 %v1143_v35, %v732_v40  ;;  %v759_v42 = vmul.f32 %v1144_v36, %v732_v40  ;;  %v776_v43 = vmul.f32 %v1145_v38, %v732_v40  ;;  %v793_v44 = vmul.f32 %v1146_v39, %v732_v40 }
 0x2aa   : > { %v733_v53 = vmul.f32 %v732_v40, %v1772_v16 }
 0x2ab   : > { %v742_v45 = vmul.f32 1.442695, %v741_v41  ;;  %v760_v46 = vmul.f32 1.442695, %v759_v42  ;;  %v777_v47 = vmul.f32 1.442695, %v776_v43 }
 0x2ac   : > { %v794_v48 = vmul.f32 1.442695, %v793_v44 }
 0x2ad   : > { %1344 = vpow2.f32 %v742_v45 }
 0x2ae   : > { %1346 = vpow2.f32 %v760_v46 }
 0x2af   : > { %1348 = vpow2.f32 %v777_v47 }
 0x2b0   : > { %1350 = vpow2.f32 %v794_v48 }
 0x2ba   : > { %v1345_v49 = vpop.eup %1344 }
 0x2bb   : > { %v1347_v50 = vpop.eup %1346  ;;  %744 = vst [vmem:[#allocation4] sm:$0xff] %v1345_v49 }
 0x2bc   : > { %v1349_v51 = vpop.eup %1348  ;;  %762 = vst [vmem:[#allocation4 + $0x8] sm:$0xff] %v1347_v50 }
 0x2bd   : > { %v1351_v52 = vpop.eup %1350  ;;  %779 = vst [vmem:[#allocation4 + $0x10] sm:$0xff] %v1349_v51 }
 0x2be   : > { %796 = vst [vmem:[#allocation4 + $0x18] sm:$0xff] %v1351_v52 }
 0x2ff   : > { %v765_v54 = vpop.permute.xlu1 %764  ;;  %v748_v56 = vpop.permute.xlu0 %747 }
 0x300   : > { %v767_v57 = vmul.f32 %v765_v54, %v733_v53  ;;  %v750_v58 = vmul.f32 %v748_v56, %v733_v53 }
 0x302   : > { %768 = vst [vmem:[#allocation5 + $0x8] sm:$0xff] %v767_v57  ;;  %751 = vst [vmem:[#allocation5] sm:$0xff] %v750_v58 }
 0x304   : > { %v782_v59 = vpop.permute.xlu1 %781 }
 0x305   : > { %v784_v60 = vmul.f32 %v782_v59, %v733_v53 }
 0x307   : > { %785 = vst [vmem:[#allocation5 + $0x10] sm:$0xff] %v784_v60 }
 0x309   : > { %v799_v61 = vpop.permute.xlu1 %798 }
 0x30a   : > { %v801_v62 = vmul.f32 %v799_v61, %v733_v53 }
 0x30c   : > { %802 = vst [vmem:[#allocation5 + $0x18] sm:$0xff] %v801_v62 }
 0x30d LB: >> { %s811_s16 = sshra.s32 %s1493_s20, 3  ;;  %s814_s18 = sand.u32 7, %s1493_s20  ;;  %s1493_s20 = sphi %s1491_s20, %s809_s20   ;;  %v1489_v63 = vphi %v1487_v63, %v1488_v63  }
 0x30e   : >> { %s1163_s28 = sshll.u32 %s811_s16, 5  ;;  %s809_s20 = sadd.s32 1, %s1493_s20  }
 0x30f   : >> { %s817_s21 = sadd.s32 %s1163_s28, %s814_s18  ;;  %p806_p8 = scmp.ge.s32.totalorder %s809_s20, 8  }
 0x310   : >> { %s818_s27 = scalar_lea.vmem [#allocation4], %s817_s21  ;;  %s821_s26 = scalar_lea.vmem [#allocation5], %s817_s21  ;;  %1173 = vmatprep.subr.bf16.mxu0 (%p806_p8), %v1497_v20  ;;  %v1501_v28 = vmov (%p806_p8), 4   ;;  %v1502_v5 = vmov (%p806_p8), 6   ;;  %v1357_v6 = vld [vmem:[%s1913_s8 + $0x38] sm:$0xff] (%p806_p8)   ;;  %v1358_v21 = vld [vmem:[%s1913_s8 + $0x30] sm:$0xff] (%p806_p8)  }
 0x311   : >> { %v819_v1 = vld [vmem:[%s818_s27] ss:$8 sm:$0xf]  ;;  %s828_s25 = scalar_lea.vmem [#allocation6], %s817_s21  ;;  %1352 = vset.pattern.permute.xlu0 (%p806_p8), %v1501_v28  ;;  %1354 = vset.pattern.permute.xlu1 (%p806_p8), %v1502_v5  ;;  %v1503_v7 = vmov (%p806_p8), 5   ;;  %v1504_v8 = vmov (%p806_p8), 7  }
 0x312   : >> { %v820_v3 = vmul.f32 %v1489_v63, %v819_v1  ;;  %808 = sbr.rel (!%p806_p8) target bundleno = 781 (0x30d), region = 115  ;;  %849 = vperm.xlu0 (%p806_p8), %1352, %v1779_v24   ;;  %861 = vperm.xlu1 (%p806_p8), %1354, %v1779_v24   ;;  %v1359_v9 = vld [vmem:[%s1913_s8 + $0x28] sm:$0xff] (%p806_p8)   ;;  %vm1505_vm5 = vmmov (%p806_p8), 0   ;;  %v1360_v10 = vld [vmem:[%s1913_s8 + $0x20] sm:$0xff] (%p806_p8)   ;;  %v1361_v11 = vld [vmem:[%s1913_s8 + $0x18] sm:$0xff] (%p806_p8)   ;;  %s1160_s21 = sshll.u32 (%p806_p8), %s1477_s12, 7 }
 0x313   : >> { %v822_v2 = vld [vmem:[%s821_s26] ss:$8 sm:$0xf]  ;;  %1174 = vmatpush3.bf16.msra.mxu0 (%p806_p8), %v1357_v6  ;;  %1189 = vmatprep.mubr.msk.bf16.mxu0 (%p806_p8), %vm1505_vm5, %v1497_v20  ;;  %v1150_v15 = vmul.f32 (%p806_p8), -1.442695, %v1767_v55  ;;  %s1002_s27 = sshll.u32 (%p806_p8), %s1800_s15, 4  ;;  %s1856_s23 = scalar_lea.hbm (%p806_p8), %s1914_s9, %s1160_s21  ;;  %s1858_s27 = int_to_ptr.vmem [resolvable:$true] %s1002_s27 }
 0x314   : >> { %v823_v4 = vadd.f32 %v822_v2, %v820_v3   ;;  %1175 = vmatprep.subr.bf16.mxu0 (%p806_p8), %v1497_v20  ;;  %v1362_v12 = vld [vmem:[%s1913_s8 + $0x10] sm:$0xff] (%p806_p8)   ;;  %v1363_v13 = vld [vmem:[%s1913_s8 + $0x8] sm:$0xff] (%p806_p8)   ;;  %v1364_v14 = vld [vmem:[%s1913_s8] sm:$0xff] (%p806_p8)   ;;  %s988_s29 = scalar_lea.sflag (%p806_p8), [#allocation9], %s1643_s19  ;;  %s1397_s17 = scalar_lea.vmem (%p806_p8), %s1858_s27, 128 }
 0x315   : > { %1365 = vpow2.f32 (%p806_p8), %v1150_v15  ;;  %v1149_v22 = vld [vmem:[%s1912_s7] ss:$0 sm:$0xff] (%p806_p8)  ;;  %p1398_p11 = scmp.ne.s32.totalorder (%p806_p8), %s1858_s27, %s1397_s17  ;;  %s1506_s12 = smov (%p806_p8), [#allocation10]  }
 0x316   : >> { %829 = vst.msk [vmem:[%s828_s25] ss:$8 sm:$0xf] %vm1706_vm0, %v823_v4  ;;  %v1488_v63 = vmov %v823_v4   ;;  %835 = vst.msk [vmem:[#allocation2] sm:$0xf] (%p806_p8), %vm1706_vm0, %v823_v4  ;;  %1353 = vset.pattern.permute.xlu0 (%p806_p8), %v1503_v7  ;;  %1355 = vset.pattern.permute.xlu1 (%p806_p8), %v1504_v8  ;;  %v847_v25 = vmul.f32 (%p806_p8), %v1149_v22, %v1772_v16  ;;  %s1401_s20 = sshll.u32 (%p806_p8), %s1506_s12, 4  ;;  %s1402_s20 = int_to_ptr.vmem [resolvable:$false] %s1401_s20 }
 0x317   : > { %855 = vperm.xlu0 %1353, %v1779_v24   ;;  %867 = vperm.xlu1 %1355, %v1779_v24   ;;  %p1399_p12 = pnand %p1398_p11, %p1608_p9  ;;  %s1403_s16 = scalar_lea.vmem %s1402_s20, 256 }
 0x318   : > { %1176 = vmatpush3.bf16.msra.mxu0 %v1358_v21  ;;  %p1404_p1 = scmp.lt.s32.totalorder %s1858_s27, %s1402_s20  ;;  %p1405_p2 = scmp.lt.s32.totalorder %s1403_s16, %s1397_s17 }
 0x319   : > { %1177 = vmatprep.subr.bf16.mxu0 %v1497_v20  ;;  %p1400_p0 = pneg %p1399_p12 }
 0x31a   : > { %p1406_p3 = por %p1405_p2, %p1404_p1 }
 0x31b   : > { %1356 = vset.pattern.permute.xlu0 %v1504_v8 }
 0x31c   : > { %1178 = vmatpush3.bf16.msra.mxu0 %v1359_v9  ;;  %p1407_p5 = pnand %p1406_p3, %p1400_p0 }
 0x31d   : > { %1179 = vmatprep.subr.bf16.mxu0 %v1497_v20  ;;  %v836_v19 = vld [vmem:[#allocation6] sm:$0xff]  ;;  %v837_v27 = vld [vmem:[#allocation6 + $0x8] sm:$0xff]  ;;  %v838_v29 = vld [vmem:[#allocation6 + $0x10] sm:$0xff] }
 0x31e   : > { %v839_v31 = vld [vmem:[#allocation6 + $0x18] sm:$0xff] }
 0x320   : > { %1180 = vmatpush3.bf16.msra.mxu0 %v1360_v10 }
 0x321   : > { %1181 = vmatprep.subr.bf16.mxu0 %v1497_v20 }
 0x322   : > { %v1366_v17 = vpop.eup %1365 }
 0x323   : > { %v875_v18 = vadd.f32 1.0, %v1366_v17 }
 0x324   : > { %1182 = vmatpush3.bf16.msra.mxu0 %v1361_v11 }
 0x325   : > { %1183 = vmatprep.subr.bf16.mxu0 %v1497_v20  ;;  %1367 = vrcp.f32 %v875_v18 }
 0x328   : > { %1184 = vmatpush3.bf16.msra.mxu0 %v1362_v12 }
 0x329   : > { %1185 = vmatprep.subr.bf16.mxu0 %v1497_v20 }
 0x32c   : > { %1186 = vmatpush3.bf16.msra.mxu0 %v1363_v13 }
 0x32d   : > { %1187 = vmatprep.subr.bf16.mxu0 %v1497_v20 }
 0x330   : > { %1188 = vmatpush3.bf16.msra.mxu0 %v1364_v14 }
 0x332   : > { %v1368_v34 = vpop.eup %1367 }
 0x333   : > { %v878_v39 = vmul.f32 %v1368_v34, %v1767_v55 }
 0x38d   : > { %v850_v23 = vpop.permute.xlu0 %849  ;;  %v862_v24 = vpop.permute.xlu1 %861 }
 0x38e   : > { %v852_v26 = vmul.f32 %v850_v23, %v836_v19  ;;  %v864_v35 = vmul.f32 %v862_v24, %v838_v29 }
 0x390   : > { %v853_v32 = vadd.f32 %v852_v26, %v847_v25 }
 0x392   : > { %v856_v20 = vpop.permute.xlu0 %855  ;;  %v868_v30 = vpop.permute.xlu1 %867 }
 0x393   : > { %v858_v33 = vmul.f32 %v856_v20, %v837_v27  ;;  %v870_v37 = vmul.f32 %v868_v30, %v839_v31 }
 0x395   : > { %v859_v36 = vadd.f32 %v858_v33, %v853_v32 }
 0x397   : > { %v865_v38 = vadd.f32 %v864_v35, %v859_v36 }
 0x399   : > { %v871_v16 = vadd.f32 %v870_v37, %v865_v38 }
 0x39b   : > { %v879_v40 = vmul.f32 %v878_v39, %v871_v16 }
 0x39d   : > { %v880_v41 = vpack.c.bf16 %v879_v40, %v879_v40 }
 0x39f   : > { %1190 = vmatmul.mubr.bf16.vlgmr.msra.gmra.mxu0 %v880_v41 }
 0x45f   : > { %v979_v42 = vpop.f32.mrf.mxu0 }
 0x460   : > { %v985_v43 = vadd.f32 %v979_v42, %v1653_v0 }
 0x461   : > { %v1191_v55 = vpop.f32.mrf.mxu0 }
 0x462   : > { %986 = vst [vmem:[%s1800_s15] sm:$0xff] %v985_v43 }
 0x463   : > { %v982_v44 = vpop.f32.mrf.mxu0 }
 0x464   : > { %1410 = shalt.err (!%p1407_p5)
}
 0x465   : > { %s1411_s15 = scalar_lea.hbm %s1856_s23, 128  ;;  %s1415_s28 = scalar_lea.hbm %s1914_s9, 256 }
 0x466   : > { %p1412_p6 = scmp.ne.s32.totalorder %s1856_s23, %s1411_s15  ;;  %p1416_p4 = scmp.lt.s32.totalorder %s1856_s23, %s1914_s9 }
 0x467   : > { %p1417_p13 = scmp.lt.s32.totalorder %s1415_s28, %s1411_s15 }
 0x468   : > { %p1413_p7 = pnand %p1412_p6, %p1608_p9 }
 0x469   : > { %p1418_p8 = por %p1417_p13, %p1416_p4 }
 0x46a   : > { %p1414_p10 = pneg %p1413_p7 }
 0x46c   : > { %p1419_p11 = pnand %p1418_p8, %p1414_p10 }
 0x46e   : > { %1422 = shalt.err (!%p1419_p11)
}
 0x46f   : > { %1195 = dma.vmem_to_hbm [thread:$0]  (%p1608_p9), %s1858_s27, 128, %s1856_s23, %s988_s29   ;;  %v1192_v0 = vpop.f32.mrf.mxu0 }
 0x470 PF: > { %s1014_s25 = sand.u32 1, %s1465_s30   ;;  %p1925_p12 = scmp.ne.s32.totalorder %s1921_s24, 0 }
 0x471   : > { %p1926_p0 = scmp.ge.s32.totalorder %s1485_s14, 2  ;;  %s1015_s17 = scalar_lea.sflag [#allocation9], %s1014_s25 }
 0x473   : > { %p1202_p1 = pnand %p1926_p0, %p1925_p12 }
 0x475   : > { %p1203_p2 = pneg %p1202_p1 }
 0x477   : > { %1460 = dma.done.wait (%p1203_p2), %s1015_s17, 128  }
 0x478   : > { %1462 = vsyncadd (%p1203_p2), %s1015_s17, 4294967168  ;;  %s25_s14 = sadd.s32 1, %s1485_s14   ;;  %s1927_s22 = sld [smem:[#allocation14_spill]] }
 0x479   : > { %p22_p3 = scmp.ge.s32.totalorder %s25_s14, 4   ;;  %s1928_s27 = sld [smem:[#allocation13_spill]] }
 0x47a   : > { %s1929_s30 = smov %s1469_s10  ;;  %s1930_s10 = smov %s1473_s11 }
 0x47b   : > { %s1932_s12 = smov %s1481_s13  ;;  %24 = sbr.rel (!%p22_p3) target bundleno = 6 (0x6), region = 126 }
 0x47e   : > { %s1931_s11 = smov %s1927_s22 }
 0x47f   : > { %s1933_s13 = smov %s1928_s27 }
 0x480   :  { %1020 = vsyncpa [#allocation8], 1 }
 0x481   :  { %1022 = vsyncpa [#allocation8 + $0x1], 1 }
 0x482   :  { %1023 = vsyncpa [#allocation9], 1 }
 0x483   :  { %1025 = vsyncpa [#allocation9 + $0x1], 1 }

</bundles_post_ra>
